<compile_context>
chip_gen: v7x
topology: tpu7x:2x2x1
jax: 0.10.0
libtpu: 0.0.40
codegen_flags: <defaults>
</compile_context>

<pallas_src>
import math

import numpy as np
import jax
import jax.numpy as jnp
from jax.experimental import pallas as pl
from jax.experimental.pallas import tpu as pltpu

HIDDEN_DIM = 32
NUM_HEADS = 4
NUM_HOPS = 2
HEAD_DIM = HIDDEN_DIM // NUM_HEADS
LN_EPS = 1e-5
NEG_INF = -1e30
# Scoped-VMEM budget: leaves headroom on v7x's 64 MiB physical; v5e/v6e have
# 128 MiB physical, so very large graphs may raise this toward ~100 MiB.
VMEM_LIMIT = 48 * 1024 * 1024

# Constant head pooling / expansion matrices (block-of-ones).  Shipped as bf16
# so per-head lane-segment sums and per-head lane broadcasts run on the (idle)
# MXU instead of XLU cross-lane reductions + lane concatenates.
_POOL_NP = np.kron(np.eye(NUM_HEADS, dtype=np.float32),
                   np.ones((HEAD_DIM, 1), np.float32))        # [H, NH]
_EXPAND_NP = np.ascontiguousarray(_POOL_NP.T)                 # [NH, H]


def _round_up(x, m):
    return ((int(x) + m - 1) // m) * m


def _full_spec(a):
    """Full-array block; constant index_map so the pipeline fetches it once."""
    nd = a.ndim
    return pl.BlockSpec(a.shape, lambda *_: (0,) * nd)


# ----------------------------------------------------------------------------
# Parameter initialization (deterministic, in-script)
# ----------------------------------------------------------------------------
def _linear(key, fan_in, fan_out):
    kw, kb = jax.random.split(key)
    bound = 1.0 / math.sqrt(fan_in)
    w = jax.random.uniform(kw, (fan_in, fan_out), jnp.float32, -bound, bound)
    b = jax.random.uniform(kb, (1, fan_out), jnp.float32, -bound, bound)
    return w, b


def make_mlp_params(key, in_dim, hidden_dim, out_dim):
    k1, k2 = jax.random.split(key)
    w1, b1 = _linear(k1, in_dim, hidden_dim)
    g1 = jnp.ones((1, hidden_dim), jnp.float32)
    be1 = jnp.zeros((1, hidden_dim), jnp.float32)
    w2, b2 = _linear(k2, hidden_dim, out_dim)
    return (w1, b1, g1, be1, w2, b2)


def make_attn_params(key, hidden_dim):
    ks = jax.random.split(key, 8)
    p = {}
    p['g1'] = jnp.ones((1, hidden_dim), jnp.float32)
    p['be1'] = jnp.zeros((1, hidden_dim), jnp.float32)
    p['wq'], p['bq'] = _linear(ks[0], hidden_dim, hidden_dim)
    wk, bk = _linear(ks[1], hidden_dim, hidden_dim)
    wv, bv = _linear(ks[2], hidden_dim, hidden_dim)
    wke, bke = _linear(ks[3], hidden_dim, hidden_dim)
    wve, bve = _linear(ks[4], hidden_dim, hidden_dim)
    # Single fused K|V projection over concat([gathered_src, edge_attr]):
    #   [E, 2H] @ [2H, 2H]  ==  xs_e @ [Wk|Wv]  +  edge_attr @ [Wke|Wve]
    p['w_kv'] = jnp.concatenate(
        [jnp.concatenate([wk, wv], axis=1),
         jnp.concatenate([wke, wve], axis=1)], axis=0)          # [2H, 2H]
    p['b_kv'] = jnp.concatenate([bk + bke, bv + bve], axis=1)   # [1, 2H]
    p['wo'], p['bo'] = _linear(ks[5], hidden_dim, hidden_dim)
    p['g2'] = jnp.ones((1, hidden_dim), jnp.float32)
    p['be2'] = jnp.zeros((1, hidden_dim), jnp.float32)
    p['wf1'], p['bf1'] = _linear(ks[6], hidden_dim, 4 * hidden_dim)
    p['wf2'], p['bf2'] = _linear(ks[7], 4 * hidden_dim, hidden_dim)
    return p


# ----------------------------------------------------------------------------
# Pallas kernels
# ----------------------------------------------------------------------------
def _layernorm(x, g, b):
    mu = jnp.mean(x, axis=-1, keepdims=True)
    var = jnp.mean(jnp.square(x - mu), axis=-1, keepdims=True)
    return (x - mu) * jax.lax.rsqrt(var + LN_EPS) * g + b


def _mm(a, b):
    # bf16 MXU inputs, f32 accumulation (one-hot masks are exact in bf16).
    return jnp.dot(a.astype(jnp.bfloat16), b.astype(jnp.bfloat16),
                   preferred_element_type=jnp.float32)


def two_layer_mlp_kernel(x_ref, w1_ref, b1_ref, g1_ref, be1_ref, w2_ref, b2_ref,
                         o_ref):
    h = _mm(x_ref[...], w1_ref[...]) + b1_ref[...]
    h = _layernorm(h, g1_ref[...], be1_ref[...])
    h = jnp.maximum(h, 0.0)
    o_ref[...] = _mm(h, w2_ref[...]) + b2_ref[...]


def two_layer_mlp(x, params):
    x = np.asarray(x, np.float32)
    n, in_dim = x.shape
    out_dim = params[-2].shape[1]
    # Large row tiles: per-grid-step overhead dominates at small tiles.
    tile = _round_up(max(n, 1), 8) if n <= 1024 else 1024
    n_pad = _round_up(max(n, 1), tile)
    x_pad = np.zeros((n_pad, in_dim), np.float32)
    x_pad[:n] = x
    x_pad = jnp.asarray(x_pad)

    out = pl.pallas_call(
        two_layer_mlp_kernel,
        out_shape=jax.ShapeDtypeStruct((n_pad, out_dim), jnp.float32),
        grid=(n_pad // tile,),
        in_specs=[pl.BlockSpec((tile, in_dim), lambda i: (i, 0))]
                 + [_full_spec(w) for w in params],
        out_specs=pl.BlockSpec((tile, out_dim), lambda i: (i, 0)),
        compiler_params=pltpu.CompilerParams(
            dimension_semantics=("parallel",),
            vmem_limit_bytes=VMEM_LIMIT),
    )(x_pad, *params)
    return out[:n]


def edge_kv_kernel(src_idx_ref, edge_attr_ref, x_src_ref, g1_ref, be1_ref,
                   w_kv_ref, b_kv_ref, kv_ref):
    """Tile-invariant edge work, hoisted out of the destination grid.

    kv[e] = LN(x_src)[src[e]] @ [Wk|Wv] + edge_attr[e] @ [Wke|Wve] + bias,
    computed as one fused [E,2H]@[2H,2H] matmul after a bf16 one-hot gather
    whose mask is generated in-kernel from int32 source indices.
    """
    xs = _layernorm(x_src_ref[...], g1_ref[...], be1_ref[...])        # [Ns, H]
    n_src = xs.shape[0]
    e_tile = kv_ref.shape[0]
    col = jax.lax.broadcasted_iota(jnp.int32, (e_tile, n_src), 1)
    src_oh = (col == src_idx_ref[...]).astype(jnp.bfloat16)           # [E, Ns]
    xs_e = _mm(src_oh, xs)                                            # [E, H]
    ze = jnp.concatenate([xs_e, edge_attr_ref[...]], axis=-1)         # [E, 2H]
    kv_ref[...] = _mm(ze, w_kv_ref[...]) + b_kv_ref[...]              # [E, 2H]


def gat_agg_kernel(dst_idx_ref, x_dst_ref, kv_ref, pool_ref, expand_ref,
                   g1_ref, be1_ref, wq_ref, bq_ref, wo_ref, bo_ref,
                   g2_ref, be2_ref, wf1_ref, bf1_ref, wf2_ref, bf2_ref,
                   o_ref):
    """Per-destination-tile attention aggregation + residual FFN."""
    tile = o_ref.shape[0]
    n_edges = kv_ref.shape[0]
    tile_start = pl.program_id(0) * tile

    # Destination one-hot for this tile, built in-kernel from int32 indices
    # (no dense [E, Nd] one-hot is ever shipped from the host).
    local = dst_idx_ref[...] - tile_start                              # [E, 1]
    col = jax.lax.broadcasted_iota(jnp.int32, (n_edges, tile), 1)
    is_dst = col == local                                              # [E, T]
    dst_oh = is_dst.astype(jnp.bfloat16)
    in_tile = jnp.logical_and(local >= 0, local < tile)                # [E, 1]

    x_dst_raw = x_dst_ref[...]                                         # [T, H]
    xd = _layernorm(x_dst_raw, g1_ref[...], be1_ref[...])
    q = _mm(xd, wq_ref[...]) + bq_ref[...]                             # [T, H]

    kv = kv_ref[...]
    k_e = kv[:, :HIDDEN_DIM]
    v_e = kv[:, HIDDEN_DIM:]

    # Per-edge per-head scores: gather q to edges with a bf16 one-hot matmul,
    # then pool the 8-lane head segments with a constant block-of-ones matmul.
    q_e = _mm(dst_oh, q)                                               # [E, H]
    qk = q_e * k_e
    scale = jnp.float32(1.0 / math.sqrt(HEAD_DIM))
    s = _mm(qk, pool_ref[...]) * scale                                 # [E, NH]

    # Per-destination max; the mask is one additive bias computed once.
    mask_bias = jnp.where(is_dst, 0.0, jnp.float32(NEG_INF))           # [E, T]
    m_rows = [jnp.max(s[:, h:h + 1] + mask_bias, axis=0, keepdims=True)
              for h in range(NUM_HEADS)]
    m_dst = jnp.concatenate(m_rows, axis=0)                            # [NH, T]
    m_e = jax.lax.dot_general(dst_oh, m_dst.astype(jnp.bfloat16),
                              (((1,), (1,)), ((), ())),
                              preferred_element_type=jnp.float32)      # [E, NH]

    # exp only on [E, NH]; subtraction stays in f32.  Softmax is invariant to
    # the per-destination constant, so bf16 rounding of the max is harmless.
    p = jnp.exp(jnp.where(in_tile, s - m_e, jnp.float32(NEG_INF)))     # [E, NH]

    # Broadcast head weights across their 8 lanes on the MXU, then one fused
    # scatter-sum produces denominators and messages together.
    p_wide = _mm(p, expand_ref[...])                                   # [E, H]
    pv = jnp.concatenate([p_wide, p_wide * v_e], axis=-1)              # [E, 2H]
    agg = jax.lax.dot_general(dst_oh, pv.astype(jnp.bfloat16),
                              (((0,), (0,)), ((), ())),
                              preferred_element_type=jnp.float32)      # [T, 2H]
    denom = agg[:, :HIDDEN_DIM]
    msg = agg[:, HIDDEN_DIM:]
    inv = pl.reciprocal(jnp.maximum(denom, 1e-20), approx=True)
    attn_heads = msg * inv                                             # [T, H]

    # TODO(synk): destinations with no incoming edges still pick up the output
    # projection bias `bo` (matches the assumed reference formulation).
    attn = _mm(attn_heads, wo_ref[...]) + bo_ref[...]
    x = x_dst_raw + attn                       # residual (dropout = eval no-op)

    xn = _layernorm(x, g2_ref[...], be2_ref[...])
    ff = jnp.maximum(_mm(xn, wf1_ref[...]) + bf1_ref[...], 0.0)
    ff = _mm(ff, wf2_ref[...]) + bf2_ref[...]
    o_ref[...] = x + ff


def graph_attention(x_src, x_dst, edge_attr, edge_index, params, *,
                    tile_nd=128, edge_tile=512):
    """HPNet-style GraphAttention block.  Self-attention == x_src is x_dst."""
    n_src = int(x_src.shape[0])
    n_dst = int(x_dst.shape[0])
    n_edges = int(edge_index.shape[1])
    src_idx = np.asarray(edge_index[0], dtype=np.int64)
    dst_idx = np.asarray(edge_index[1], dtype=np.int64)

    ns_pad = _round_up(max(n_src, 1), 8)
    if n_dst <= 2 * tile_nd:
        tile_d = _round_up(max(n_dst, 1), 8)
        nd_pad = tile_d
    else:
        tile_d = tile_nd
        nd_pad = _round_up(n_dst, tile_d)
    e_raw = _round_up(max(n_edges, 1), 8)
    if e_raw <= 2 * edge_tile:
        tile_e = e_raw
        e_pad = e_raw
    else:
        tile_e = edge_tile
        e_pad = _round_up(e_raw, tile_e)
    # TODO(synk): for very large maps (E x tile_d intermediates > VMEM on v7x)
    # the aggregation kernel would additionally need an edge-axis grid
    # dimension with an accumulator; not needed at these sizes.

    # int32 edge endpoints; padded edges get index -1 (matches nothing).
    src_col = np.full((e_pad, 1), -1, np.int32)
    src_col[:n_edges, 0] = src_idx
    dst_col = np.full((e_pad, 1), -1, np.int32)
    dst_col[:n_edges, 0] = dst_idx
    src_col = jnp.asarray(src_col)
    dst_col = jnp.asarray(dst_col)

    x_src_p = jnp.pad(jnp.asarray(x_src, jnp.float32),
                      ((0, ns_pad - n_src), (0, 0)))
    x_dst_p = jnp.pad(jnp.asarray(x_dst, jnp.float32),
                      ((0, nd_pad - n_dst), (0, 0)))
    edge_attr_p = jnp.pad(jnp.asarray(edge_attr, jnp.float32),
                          ((0, e_pad - n_edges), (0, 0)))

    p = params

    # ---- pass 1: tile-invariant edge K|V (hoisted out of the dst grid) ----
    kv = pl.pallas_call(
        edge_kv_kernel,
        out_shape=jax.ShapeDtypeStruct((e_pad, 2 * HIDDEN_DIM), jnp.float32),
        grid=(e_pad // tile_e,),
        in_specs=[pl.BlockSpec((tile_e, 1), lambda i: (i, 0)),
                  pl.BlockSpec((tile_e, HIDDEN_DIM), lambda i: (i, 0)),
                  _full_spec(x_src_p),
                  _full_spec(p['g1']), _full_spec(p['be1']),
                  _full_spec(p['w_kv']), _full_spec(p['b_kv'])],
        out_specs=pl.BlockSpec((tile_e, 2 * HIDDEN_DIM), lambda i: (i, 0)),
        compiler_params=pltpu.CompilerParams(
            dimension_semantics=("parallel",),
            vmem_limit_bytes=VMEM_LIMIT),
    )(src_col, edge_attr_p, x_src_p, p['g1'], p['be1'], p['w_kv'], p['b_kv'])

    # ---- pass 2: per-destination-tile attention + FFN ----
    pool = jnp.asarray(_POOL_NP, jnp.bfloat16)
    expand = jnp.asarray(_EXPAND_NP, jnp.bfloat16)
    w_args = (pool, expand, p['g1'], p['be1'], p['wq'], p['bq'],
              p['wo'], p['bo'], p['g2'], p['be2'],
              p['wf1'], p['bf1'], p['wf2'], p['bf2'])

    out = pl.pallas_call(
        gat_agg_kernel,
        out_shape=jax.ShapeDtypeStruct((nd_pad, HIDDEN_DIM), jnp.float32),
        grid=(nd_pad // tile_d,),
        in_specs=[_full_spec(dst_col),
                  pl.BlockSpec((tile_d, HIDDEN_DIM), lambda i: (i, 0)),
                  _full_spec(kv)]
                 + [_full_spec(w) for w in w_args],
        out_specs=pl.BlockSpec((tile_d, HIDDEN_DIM), lambda i: (i, 0)),
        compiler_params=pltpu.CompilerParams(
            dimension_semantics=("parallel",),
            vmem_limit_bytes=VMEM_LIMIT),
    )(dst_col, x_dst_p, kv, *w_args)
    return out[:n_dst]


# ----------------------------------------------------------------------------
# Host-side graph helpers (glue, numpy)
# ----------------------------------------------------------------------------
def wrap_angle(a):
    return (a + np.pi) % (2.0 * np.pi) - np.pi


def transform_point_to_local_coordinate(point, position, heading):
    d = point - position
    c, s = np.cos(heading), np.sin(heading)
    x = c * d[:, 0] + s * d[:, 1]
    y = -s * d[:, 0] + c * d[:, 1]
    return np.stack([x, y], axis=-1)


def compute_angles_lengths_2D(vec):
    length = np.linalg.norm(vec, axis=-1)
    theta = np.arctan2(vec[:, 1], vec[:, 0])
    return length, theta


def transform_edge_index(edge_index_list, src_num_nodes, dst_num_nodes):
    src_off = np.concatenate([[0], np.cumsum(src_num_nodes)[:-1]]).astype(np.int64)
    dst_off = np.concatenate([[0], np.cumsum(dst_num_nodes)[:-1]]).astype(np.int64)
    parts = []
    for i, ei in enumerate(edge_index_list):
        ei = np.asarray(ei, dtype=np.int64)
        parts.append(np.stack([ei[0] + src_off[i], ei[1] + dst_off[i]]))
    return np.concatenate(parts, axis=1)


def transform_edge_index1(edge_index_list, num_nodes):
    return transform_edge_index(edge_index_list, num_nodes, num_nodes)


def compute_n_hop_edge_indices(edge_index, num_nodes, extra_hops):
    adj = np.zeros((num_nodes, num_nodes), dtype=bool)
    adj[edge_index[0], edge_index[1]] = True
    reach = adj.copy()
    seen = adj.copy()
    out = [np.stack(np.nonzero(adj)).astype(np.int64)]
    for _ in range(extra_hops):
        reach = (reach.astype(np.int32) @ adj.astype(np.int32)) > 0
        new = reach & ~seen
        np.fill_diagonal(new, False)
        seen |= new
        out.append(np.stack(np.nonzero(new)).astype(np.int64))
    return out


def get_index(num_nodes):
    offsets = np.concatenate([[0], np.cumsum(num_nodes)]).astype(np.int64)
    idcs = [np.arange(offsets[i], offsets[i + 1]) for i in range(len(num_nodes))]
    return idcs, offsets[:-1]


# ----------------------------------------------------------------------------
# MapEncoder (JAX/numpy glue + Pallas kernels)
# ----------------------------------------------------------------------------
class MapEncoderPallas:
    _l2l_edge_type = ['adjacent', 'predecessor', 'successor']

    def __init__(self, hidden_dim, num_hops, num_heads, key):
        keys = jax.random.split(key, 6)
        self.hidden_dim = hidden_dim
        self.num_hops = num_hops
        self.num_heads = num_heads
        self.c_emb = make_mlp_params(keys[0], 4, hidden_dim, hidden_dim)
        self.l_emb = make_mlp_params(keys[1], 7, hidden_dim, hidden_dim)
        self.c2l_emb = make_mlp_params(keys[2], 3, hidden_dim, hidden_dim)
        self.l2l_emb = make_mlp_params(keys[3], 7, hidden_dim, hidden_dim)
        self.c2l_attn = make_attn_params(keys[4], hidden_dim)
        self.l2l_attn = make_attn_params(keys[5], hidden_dim)

    def __call__(self, data):
        # ---- centerline node embeddings ----
        c_length = np.concatenate(data['centerline_length'])
        c2l_position_c = np.concatenate(data['centerline_position'], axis=0)
        c2l_feats_c = np.concatenate(data['centerline_feats'], axis=0)
        c2l_heading_c = np.concatenate(data['centerline_heading'])
        c_input = np.concatenate(
            [c2l_feats_c, c2l_heading_c[:, None], c_length[:, None]], axis=-1)
        c_embs = two_layer_mlp(c_input, self.c_emb)

        # ---- lane node embeddings ----
        c2l_position_l = np.concatenate(data['lane_position'], axis=0)
        c2l_feats_l = np.concatenate(data['lane_feats'], axis=0)
        l_length = np.concatenate(data['lane_length'])
        l_is_inter = np.concatenate(data['lane_is_intersection'])[:, None]
        l_turn = np.concatenate(data['lane_turn_direction'])[:, None]
        l_tc = np.concatenate(data['lane_traffic_control'])[:, None]
        c2l_heading_l = np.concatenate(data['lane_heading'])
        l_input = np.concatenate(
            [c2l_feats_l, l_length[:, None], c2l_heading_l[:, None],
             l_is_inter, l_turn, l_tc], axis=-1)
        l_embs = two_layer_mlp(l_input, self.l_emb)

        # ---- centerline -> lane edges ----
        c2l_edge_index = transform_edge_index(
            data['centerline_to_lane_edge_index'],
            data['centerline_num_nodes'], data['lane_num_nodes'])
        c2l_vec = transform_point_to_local_coordinate(
            c2l_position_c[c2l_edge_index[0]],
            c2l_position_l[c2l_edge_index[1]],
            c2l_heading_l[c2l_edge_index[1]])
        c2l_len, c2l_theta = compute_angles_lengths_2D(c2l_vec)
        c2l_head = wrap_angle(
            c2l_heading_c[c2l_edge_index[0]] - c2l_heading_l[c2l_edge_index[1]])
        c2l_edge_attr_input = np.stack([c2l_len, c2l_theta, c2l_head], axis=-1)
        c2l_edge_attr_embs = two_layer_mlp(c2l_edge_attr_input, self.c2l_emb)

        # ---- lane -> lane edges (adjacent / predecessor / successor n-hop) ----
        l2l_position = np.concatenate(data['lane_position'], axis=0)
        l2l_heading = np.concatenate(data['lane_heading'])
        num_lanes = int(sum(data['lane_num_nodes']))
        eye3 = np.eye(3, dtype=np.float32)

        l2l_edge_index, l2l_type, l2l_hop = [], [], []

        adj_ei = transform_edge_index1(data['adjacent_edge_index'],
                                       data['lane_num_nodes'])
        l2l_edge_index.append(adj_ei)
        l2l_type.append(np.tile(eye3[0], (adj_ei.shape[1], 1)))
        l2l_hop.append(np.ones(adj_ei.shape[1], dtype=np.float32))

        pred_ei = transform_edge_index1(data['predecessor_edge_index'],
                                        data['lane_num_nodes'])
        pred_all = compute_n_hop_edge_indices(pred_ei, num_lanes, self.num_hops - 1)
        for i in range(self.num_hops):
            ei = pred_all[i]
            l2l_edge_index.append(ei)
            l2l_type.append(np.tile(eye3[1], (ei.shape[1], 1)))
            l2l_hop.append((i + 1) * np.ones(ei.shape[1], dtype=np.float32))

        succ_ei = transform_edge_index1(data['successor_edge_index'],
                                        data['lane_num_nodes'])
        succ_all = compute_n_hop_edge_indices(succ_ei, num_lanes, self.num_hops - 1)
        for i in range(self.num_hops):
            ei = succ_all[i]
            l2l_edge_index.append(ei)
            l2l_type.append(np.tile(eye3[2], (ei.shape[1], 1)))
            l2l_hop.append((i + 1) * np.ones(ei.shape[1], dtype=np.float32))

        l2l_edge_index = np.concatenate(l2l_edge_index, axis=1)
        l2l_type = np.concatenate(l2l_type, axis=0)
        l2l_hop = np.concatenate(l2l_hop, axis=0)

        l2l_vec = transform_point_to_local_coordinate(
            l2l_position[l2l_edge_index[0]], l2l_position[l2l_edge_index[1]],
            l2l_heading[l2l_edge_index[1]])
        l2l_len, l2l_theta = compute_angles_lengths_2D(l2l_vec)
        l2l_head = wrap_angle(
            l2l_heading[l2l_edge_index[0]] - l2l_heading[l2l_edge_index[1]])
        l2l_edge_attr_input = np.concatenate(
            [l2l_len[:, None], l2l_theta[:, None], l2l_head[:, None],
             l2l_hop[:, None], l2l_type], axis=-1)
        l2l_edge_attr_embs = two_layer_mlp(l2l_edge_attr_input, self.l2l_emb)

        # ---- graph attention blocks (Pallas, two-pass: edge K|V + agg) ----
        l_embs = graph_attention(c_embs, l_embs, c2l_edge_attr_embs,
                                 c2l_edge_index, self.c2l_attn)
        l_embs = graph_attention(l_embs, l_embs, l2l_edge_attr_embs,
                                 l2l_edge_index, self.l2l_attn)

        # ---- per-graph gather + pad_sequence (single gather + mask) ----
        lane_nums = [int(n) for n in data['lane_num_nodes']]
        offsets = np.concatenate([[0], np.cumsum(lane_nums)]).astype(np.int64)
        max_l = max(lane_nums)
        bsz = len(lane_nums)
        gather_idx = np.zeros((bsz, max_l), np.int32)
        gather_mask = np.zeros((bsz, max_l, 1), np.float32)
        for i, n in enumerate(lane_nums):
            gather_idx[i, :n] = np.arange(offsets[i], offsets[i] + n)
            gather_mask[i, :n, 0] = 1.0
        result = jnp.take(l_embs, jnp.asarray(gather_idx), axis=0)
        return result * jnp.asarray(gather_mask)


# ----------------------------------------------------------------------------
# Synthetic data + driver
# ----------------------------------------------------------------------------
if __name__ == "__main__":
    key = jax.random.PRNGKey(0)
    pkey, dkey = jax.random.split(key)
    encoder = MapEncoderPallas(HIDDEN_DIM, NUM_HOPS, NUM_HEADS, pkey)

    centerline_nums = [6, 5]
    lane_nums = [4, 4]
    dkeys = list(jax.random.split(dkey, 64))
    _ki = iter(dkeys)

    def rnd(shape, scale=1.0):
        return np.asarray(jax.random.normal(next(_ki), shape, jnp.float32)) * scale

    def rang(shape):
        return np.asarray(jax.random.uniform(next(_ki), shape, jnp.float32,
                                             -np.pi, np.pi))

    data = {
        'centerline_length': [np.abs(rnd((c,))) + 0.5 for c in centerline_nums],
        'centerline_position': [rnd((c, 2), 10.0) for c in centerline_nums],
        'centerline_feats': [rnd((c, 2)) for c in centerline_nums],
        'centerline_heading': [rang((c,)) for c in centerline_nums],
        'lane_position': [rnd((l, 2), 10.0) for l in lane_nums],
        'lane_feats': [rnd((l, 2)) for l in lane_nums],
        'lane_length': [np.abs(rnd((l,))) + 1.0 for l in lane_nums],
        'lane_is_intersection': [np.array([0., 1., 0., 1.], np.float32)[:l]
                                 for l in lane_nums],
        'lane_turn_direction': [np.array([0., 1., 2., 0.], np.float32)[:l]
                                for l in lane_nums],
        'lane_traffic_control': [np.array([1., 0., 1., 0.], np.float32)[:l]
                                 for l in lane_nums],
        'lane_heading': [rang((l,)) for l in lane_nums],
        'centerline_num_nodes': centerline_nums,
        'lane_num_nodes': lane_nums,
        # local (per-graph) edge indices, row0 = source, row1 = destination
        'centerline_to_lane_edge_index': [
            np.array([[0, 1, 2, 3, 4, 5], [0, 1, 2, 3, 0, 1]], np.int64),
            np.array([[0, 1, 2, 3, 4], [0, 1, 2, 3, 0]], np.int64),
        ],
        'adjacent_edge_index': [
            np.array([[0, 1, 2, 3], [1, 0, 3, 2]], np.int64),
            np.array([[0, 1], [1, 0]], np.int64),
        ],
        'predecessor_edge_index': [
            np.array([[0, 1, 2], [1, 2, 3]], np.int64),
            np.array([[0, 1, 2], [1, 2, 3]], np.int64),
        ],
        'successor_edge_index': [
            np.array([[1, 2, 3], [0, 1, 2]], np.int64),
            np.array([[1, 2, 3], [0, 1, 2]], np.int64),
        ],
    }

    result = encoder(data)
    result = jax.block_until_ready(result)
    assert result.shape == (len(lane_nums), max(lane_nums), HIDDEN_DIM)
    assert np.all(np.isfinite(np.asarray(result)))
    print("KERNEL_OK")
</pallas_src>

<mosaic_0001>
module attributes {stable_mosaic.version = 11 : i64} {
  func.func @two_layer_mlp_kernel(%arg0: i32, %arg1: memref<16x4xf32, #tpu.memory_space<vmem>>, %arg2: memref<4x32xf32, #tpu.memory_space<vmem>>, %arg3: memref<1x32xf32, #tpu.memory_space<vmem>>, %arg4: memref<1x32xf32, #tpu.memory_space<vmem>>, %arg5: memref<1x32xf32, #tpu.memory_space<vmem>>, %arg6: memref<32x32xf32, #tpu.memory_space<vmem>>, %arg7: memref<1x32xf32, #tpu.memory_space<vmem>>, %arg8: memref<16x32xf32, #tpu.memory_space<vmem>>) attributes {dimension_semantics = [#tpu.dimension_semantics<parallel>], iteration_bounds = array<i64: 1>, scalar_prefetch = 0 : i64, scratch_operands = 0 : i64, tpu.core_type = #tpu.core_type<tc>, window_params = [{transform_indices = @transform_0, window_bounds = array<i64: 16, 4>}, {pipeline_mode = #tpu.pipeline_mode<synchronous>, transform_indices = @transform_1, window_bounds = array<i64: 4, 32>}, {pipeline_mode = #tpu.pipeline_mode<synchronous>, transform_indices = @transform_2, window_bounds = array<i64: 1, 32>}, {pipeline_mode = #tpu.pipeline_mode<synchronous>, transform_indices = @transform_3, window_bounds = array<i64: 1, 32>}, {pipeline_mode = #tpu.pipeline_mode<synchronous>, transform_indices = @transform_4, window_bounds = array<i64: 1, 32>}, {pipeline_mode = #tpu.pipeline_mode<synchronous>, transform_indices = @transform_5, window_bounds = array<i64: 32, 32>}, {pipeline_mode = #tpu.pipeline_mode<synchronous>, transform_indices = @transform_6, window_bounds = array<i64: 1, 32>}, {transform_indices = @transform_7, window_bounds = array<i64: 16, 32>}]} {
    %c0 = arith.constant 0 : index
    %c0_0 = arith.constant 0 : index
    %0 = vector.load %arg1[%c0, %c0_0] : memref<16x4xf32, #tpu.memory_space<vmem>>, vector<16x4xf32>
    %c0_1 = arith.constant 0 : index
    %c0_2 = arith.constant 0 : index
    %1 = vector.load %arg2[%c0_1, %c0_2] : memref<4x32xf32, #tpu.memory_space<vmem>>, vector<4x32xf32>
    %2 = arith.truncf %0 : vector<16x4xf32> to vector<16x4xbf16>
    %3 = arith.truncf %1 : vector<4x32xf32> to vector<4x32xbf16>
    %cst = arith.constant dense<0.000000e+00> : vector<16x32xf32>
    %4 = tpu.matmul %2, %3, %cst {dimension_numbers = #tpu.dot_dimension_numbers<[1], [0], [0], [1], [0, 0, 1, 1], [], []>} : vector<16x4xbf16>, vector<4x32xbf16>, vector<16x32xf32> -> vector<16x32xf32>
    %c0_3 = arith.constant 0 : index
    %c0_4 = arith.constant 0 : index
    %5 = vector.load %arg3[%c0_3, %c0_4] : memref<1x32xf32, #tpu.memory_space<vmem>>, vector<1x32xf32>
    %6 = vector.broadcast %5 : vector<1x32xf32> to vector<16x32xf32>
    %7 = arith.addf %4, %6 : vector<16x32xf32>
    %c0_5 = arith.constant 0 : index
    %c0_6 = arith.constant 0 : index
    %8 = vector.load %arg4[%c0_5, %c0_6] : memref<1x32xf32, #tpu.memory_space<vmem>>, vector<1x32xf32>
    %c0_7 = arith.constant 0 : index
    %c0_8 = arith.constant 0 : index
    %9 = vector.load %arg5[%c0_7, %c0_8] : memref<1x32xf32, #tpu.memory_space<vmem>>, vector<1x32xf32>
    %cst_9 = arith.constant dense<0.000000e+00> : vector<16xf32>
    %10 = vector.multi_reduction <add>, %7, %cst_9 [1] : vector<16x32xf32> to vector<16xf32>
    %11 = vector.shape_cast %10 : vector<16xf32> to vector<16x1xf32>
    %cst_10 = arith.constant 3.200000e+01 : f32
    %12 = vector.broadcast %cst_10 : f32 to vector<16x1xf32>
    %13 = arith.divf %11, %12 : vector<16x1xf32>
    %14 = vector.broadcast %13 : vector<16x1xf32> to vector<16x32xf32>
    %15 = arith.subf %7, %14 : vector<16x32xf32>
    %16 = arith.mulf %15, %15 : vector<16x32xf32>
    %cst_11 = arith.constant dense<0.000000e+00> : vector<16xf32>
    %17 = vector.multi_reduction <add>, %16, %cst_11 [1] : vector<16x32xf32> to vector<16xf32>
    %18 = vector.shape_cast %17 : vector<16xf32> to vector<16x1xf32>
    %cst_12 = arith.constant 3.200000e+01 : f32
    %19 = vector.broadcast %cst_12 : f32 to vector<16x1xf32>
    %20 = arith.divf %18, %19 : vector<16x1xf32>
    %21 = vector.broadcast %13 : vector<16x1xf32> to vector<16x32xf32>
    %22 = arith.subf %7, %21 : vector<16x32xf32>
    %cst_13 = arith.constant 9.99999974E-6 : f32
    %23 = vector.broadcast %cst_13 : f32 to vector<16x1xf32>
    %24 = arith.addf %20, %23 : vector<16x1xf32>
    %25 = math.rsqrt %24 : vector<16x1xf32>
    %26 = vector.broadcast %25 : vector<16x1xf32> to vector<16x32xf32>
    %27 = arith.mulf %22, %26 : vector<16x32xf32>
    %28 = vector.broadcast %8 : vector<1x32xf32> to vector<16x32xf32>
    %29 = arith.mulf %27, %28 : vector<16x32xf32>
    %30 = vector.broadcast %9 : vector<1x32xf32> to vector<16x32xf32>
    %31 = arith.addf %29, %30 : vector<16x32xf32>
    %cst_14 = arith.constant 0.000000e+00 : f32
    %32 = vector.broadcast %cst_14 : f32 to vector<16x32xf32>
    %33 = arith.maximumf %31, %32 : vector<16x32xf32>
    %c0_15 = arith.constant 0 : index
    %c0_16 = arith.constant 0 : index
    %34 = vector.load %arg6[%c0_15, %c0_16] : memref<32x32xf32, #tpu.memory_space<vmem>>, vector<32x32xf32>
    %35 = arith.truncf %33 : vector<16x32xf32> to vector<16x32xbf16>
    %36 = arith.truncf %34 : vector<32x32xf32> to vector<32x32xbf16>
    %cst_17 = arith.constant dense<0.000000e+00> : vector<16x32xf32>
    %37 = tpu.matmul %35, %36, %cst_17 {dimension_numbers = #tpu.dot_dimension_numbers<[1], [0], [0], [1], [0, 0, 1, 1], [], []>} : vector<16x32xbf16>, vector<32x32xbf16>, vector<16x32xf32> -> vector<16x32xf32>
    %c0_18 = arith.constant 0 : index
    %c0_19 = arith.constant 0 : index
    %38 = vector.load %arg7[%c0_18, %c0_19] : memref<1x32xf32, #tpu.memory_space<vmem>>, vector<1x32xf32>
    %39 = vector.broadcast %38 : vector<1x32xf32> to vector<16x32xf32>
    %40 = arith.addf %37, %39 : vector<16x32xf32>
    %c0_20 = arith.constant 0 : index
    %c0_21 = arith.constant 0 : index
    %41 = vector.load %arg8[%c0_20, %c0_21] : memref<16x32xf32, #tpu.memory_space<vmem>>, vector<16x32xf32>
    tpu.vector_store %arg8[%c0_20, %c0_21], %40 {strides = array<i32>} : memref<16x32xf32, #tpu.memory_space<vmem>>, vector<16x32xf32>,
    return
  }
  func.func @transform_0(%arg0: i32) -> (i32, i32) {
    %c0_i32 = arith.constant 0 : i32
    %c0_i32_0 = arith.constant 0 : i32
    return %arg0, %c0_i32 : i32, i32
  }
  func.func @transform_1(%arg0: i32) -> (i32, i32) {
    %c0_i32 = arith.constant 0 : i32
    %c0_i32_0 = arith.constant 0 : i32
    %c0_i32_1 = arith.constant 0 : i32
    return %c0_i32, %c0_i32_0 : i32, i32
  }
  func.func @transform_2(%arg0: i32) -> (i32, i32) {
    %c0_i32 = arith.constant 0 : i32
    %c0_i32_0 = arith.constant 0 : i32
    %c0_i32_1 = arith.constant 0 : i32
    return %c0_i32, %c0_i32_0 : i32, i32
  }
  func.func @transform_3(%arg0: i32) -> (i32, i32) {
    %c0_i32 = arith.constant 0 : i32
    %c0_i32_0 = arith.constant 0 : i32
    %c0_i32_1 = arith.constant 0 : i32
    return %c0_i32, %c0_i32_0 : i32, i32
  }
  func.func @transform_4(%arg0: i32) -> (i32, i32) {
    %c0_i32 = arith.constant 0 : i32
    %c0_i32_0 = arith.constant 0 : i32
    %c0_i32_1 = arith.constant 0 : i32
    return %c0_i32, %c0_i32_0 : i32, i32
  }
  func.func @transform_5(%arg0: i32) -> (i32, i32) {
    %c0_i32 = arith.constant 0 : i32
    %c0_i32_0 = arith.constant 0 : i32
    %c0_i32_1 = arith.constant 0 : i32
    return %c0_i32, %c0_i32_0 : i32, i32
  }
  func.func @transform_6(%arg0: i32) -> (i32, i32) {
    %c0_i32 = arith.constant 0 : i32
    %c0_i32_0 = arith.constant 0 : i32
    %c0_i32_1 = arith.constant 0 : i32
    return %c0_i32, %c0_i32_0 : i32, i32
  }
  func.func @transform_7(%arg0: i32) -> (i32, i32) {
    %c0_i32 = arith.constant 0 : i32
    %c0_i32_0 = arith.constant 0 : i32
    return %arg0, %c0_i32 : i32, i32
  }
}

</mosaic_0001>

<bundles_post_ra>
// kernel: tpu_custom_call.1
= control target key start
LH: loop header
LB: loop body
LE: loop exit
PB: predicated region body
PF: predicated region fallthrough
CT: control target
= control target key end

     0   :  { %12 = vsyncpa [#allocation3], 0  ;;  %s416_s0 = inlined_call_operand.vmem [shape: f32[16,4], index: 0, kind: input, shape index: {}]   ;;  %s417_s1 = inlined_call_operand.vmem [shape: f32[4,32], index: 1, kind: input, shape index: {}]   ;;  %s418_s2 = inlined_call_operand.vmem [shape: f32[1,32], index: 2, kind: input, shape index: {}]   ;;  %s419_s3 = inlined_call_operand.vmem [shape: f32[1,32], index: 3, kind: input, shape index: {}]   ;;  %s420_s4 = inlined_call_operand.hbm [shape: f32[1,32], index: 4, kind: input, shape index: {}]   ;;  %s421_s5 = inlined_call_operand.vmem [shape: f32[32,32], index: 5, kind: input, shape index: {}]   ;;  %s422_s6 = inlined_call_operand.vmem [shape: f32[1,32], index: 6, kind: input, shape index: {}]   ;;  %s423_s7 = inlined_call_operand.hbm [shape: f32[16,32], index: 7, kind: output, shape index: {}]  }
   0x1   :  { %13 = vsyncpa [#allocation4], 0  ;;  %s309_s24 = smov [#allocation2]   ;;  %s261_s28 = scalar_lea.hbm %s420_s4, 16 }
   0x2   :  { %s28_s25 = sshll.u32 %s309_s24, 4  ;;  %p262_p0 = scmp.ne.s32.totalorder %s420_s4, %s261_s28  ;;  %s29_s25 = int_to_ptr.vmem [resolvable:$true] %s28_s25 }
   0x3   :  { %p265_p1 = scmp.lt.u32.totalorder %s261_s28, %s420_s4 }
   0x5   :  { %p267_p2 = pnand %p265_p1, %p262_p0 }
   0x7   :  { %270 = shalt.err (!%p267_p2)
}
   0x8   :  { %s271_s10 = scalar_lea.vmem %s29_s25, 16  ;;  %s275_s11 = scalar_lea.vmem %s29_s25, 32 }
   0x9   :  { %p272_p3 = scmp.ne.s32.totalorder %s29_s25, %s271_s10  ;;  %p276_p4 = scmp.lt.s32.totalorder %s29_s25, %s29_s25 }
   0xa   :  { %p277_p5 = scmp.lt.s32.totalorder %s275_s11, %s271_s10 }
   0xc   :  { %p278_p6 = por %p277_p5, %p276_p4 }
   0xe   :  { %p279_p7 = pnand %p278_p6, %p272_p3 }
  0x10   :  { %282 = shalt.err (!%p279_p7)
}
  0x11   :  { %31 = dma.hbm_to_vmem [thread:$0]  %s420_s4, 16, %s29_s25, [#allocation3]  }
  0x12   :  { %305 = dma.done.wait [#allocation3], 16  }
  0x13   :  { %306 = vsyncadd [#allocation3], 4294967280  ;;  %v310_v0 = vmov 0.0   ;;  %vm311_vm0 = vmmov 0   ;;  %v42_v1 = vld [vmem:[%s417_s1] sm:$0xf] }
  0x14   :  { %237 = vmatprep.subr.bf16.mxu0 %v310_v0  ;;  %239 = vmatprep.mubr.msk.bf16.mxu0 %vm311_vm0, %v310_v0  ;;  %vm56_vm1 = vcmask 1041408   ;;  %v40_v2 = vld [vmem:[%s416_s0] sm:$0xff]  ;;  %v41_v3 = vld [vmem:[%s416_s0 + $0x8] sm:$0xff]  ;;  %v44_v4 = vpack.c.bf16 %v42_v1, %v42_v1  ;;  %vm52_vm2 = vcmask 31744   ;;  %vm103_vm3 = vcmask 261120   ;;  %v151_v28 = vld [vmem:[%s421_s5 + $0x10] sm:$0xff] }
  0x15   :  { %243 = vmatprep.subr.bf16.mxu1 %v310_v0  ;;  %247 = vmatprep.mubr.msk.bf16.mxu1 %vm311_vm0, %v310_v0  ;;  %v43_v6 = vpack.c.bf16 %v41_v3, %v40_v2  ;;  %v226_v7 = vld [vmem:[%s418_s2] ss:$0 sm:$0xff]  ;;  %v150_v27 = vld [vmem:[%s421_s5 + $0x8] sm:$0xff]  ;;  %v152_v30 = vld [vmem:[%s421_s5 + $0x18] sm:$0xff]  ;;  %s312_s29 = smov [#allocation5]  }
  0x16   :  { %v58_v5 = vsel %vm56_vm1, %v44_v4, 0  ;;  %v149_v26 = vld [vmem:[%s421_s5] sm:$0xff]  ;;  %v155_v31 = vpack.c.bf16 %v152_v30, %v151_v28  ;;  %s214_s30 = sshll.u32 %s312_s29, 4  ;;  %s215_s30 = int_to_ptr.vmem [resolvable:$true] %s214_s30 }
  0x17   :  { %238 = vmatpush3.bf16.msra.mxu0 %v58_v5  ;;  %v154_v29 = vpack.c.bf16 %v150_v27, %v149_v26  ;;  %v228_v39 = vld [vmem:[%s419_s3] ss:$0 sm:$0xff]  ;;  %s283_s3 = scalar_lea.vmem %s215_s30, 256  ;;  %p288_p9 = scmp.lt.s32.totalorder %s215_s30, %s215_s30 }
  0x18   :  { %v229_v43 = vld [vmem:[#allocation2] ss:$0 sm:$0xff]  ;;  %p284_p8 = scmp.ne.s32.totalorder %s215_s30, %s283_s3  ;;  %p289_p10 = scmp.lt.s32.totalorder %s283_s3, %s283_s3 }
  0x19   :  { %244 = vmatpush3.bf16.msra.mxu1 %v154_v29  ;;  %v230_v51 = vld [vmem:[%s422_s6] ss:$0 sm:$0xff] }
  0x1a   :  { %240 = vmatmul.mubr.msk.bf16.vlgmr.msra.gmra.mrb[0].mxu0 %vm52_vm2, %v43_v6  ;;  %245 = vmatprep.subr.bf16.mxu1 %v310_v0  ;;  %p290_p11 = por %p289_p10, %p288_p9 }
  0x1c   :  { %p291_p12 = pnand %p290_p11, %p284_p8 }
  0x1d   :  { %246 = vmatpush3.bf16.msra.mxu1 %v155_v31 }
  0xed   :  { %v94_v8 = vpop.f32.mrb[0].mxu0 }
  0xee   :  { %v95_v9 = vadd.f32 %v226_v7, %v94_v8  ;;  %v241_v10 = vpop.f32.mrb[1].mxu0 }
  0xef   :  { %v97_v11 = vpop.f32.mrb[2].mxu0 }
  0xf0   :  { %v98_v12 = vadd.f32 %v226_v7, %v97_v11  ;;  %v242_v13 = vpop.f32.mrb[3].mxu0  ;;  %v104_v14 = vsel %vm103_vm3, %v95_v9, 0.0 }
  0xf1   :  { %105 = vadd.xlane.f32.xlu0 %v104_v14 }
  0xf2   :  { %v107_v15 = vsel %vm103_vm3, %v98_v12, 0.0 }
  0xf5   :  { %108 = vadd.xlane.f32.xlu0 %v107_v15 }
 0x17e   :  { %v106_v16 = vpop.xlane.xlu0 %105 }
 0x17f   :  { %v111_v17 = vmul.f32 0.03125, %v106_v16 }
 0x181   :  { %v113_v18 = vsub.f32 %v95_v9, %v111_v17 }
 0x182   :  { %v109_v19 = vpop.xlane.xlu0 %108 }
 0x183   :  { %v112_v20 = vmul.f32 0.03125, %v109_v19  ;;  %v115_v21 = vmul.f32 %v113_v18, %v113_v18 }
 0x185   :  { %v114_v22 = vsub.f32 %v98_v12, %v112_v20  ;;  %v117_v23 = vsel %vm103_vm3, %v115_v21, 0.0 }
 0x186   :  { %118 = vadd.xlane.f32.xlu1 %v117_v23 }
 0x187   :  { %v116_v24 = vmul.f32 %v114_v22, %v114_v22 }
 0x189   :  { %v120_v25 = vsel %vm103_vm3, %v116_v24, 0.0 }
 0x18a   :  { %121 = vadd.xlane.f32.xlu1 %v120_v25 }
 0x213   :  { %v119_v32 = vpop.xlane.xlu1 %118 }
 0x214   :  { %v123_v33 = vmul.f32 0.03125, %v119_v32 }
 0x216   :  { %v125_v34 = vadd.f32 1e-05, %v123_v33 }
 0x217   :  { %v122_v35 = vpop.xlane.xlu1 %121 }
 0x218   :  { %257 = vrsqrt.f32 %v125_v34  ;;  %v124_v36 = vmul.f32 0.03125, %v122_v35 }
 0x21a   :  { %v126_v37 = vadd.f32 1e-05, %v124_v36 }
 0x21c   :  { %259 = vrsqrt.f32 %v126_v37 }
 0x222   :  { %v258_v38 = vpop.eup %257 }
 0x223   :  { %v129_v40 = vmul.f32 %v258_v38, %v113_v18 }
 0x225   :  { %v137_v41 = vmul.f32 %v228_v39, %v129_v40 }
 0x226   :  { %v260_v42 = vpop.eup %259 }
 0x227   :  { %v130_v44 = vmul.f32 %v260_v42, %v114_v22  ;;  %v145_v46 = vadd.f32 %v229_v43, %v137_v41 }
 0x229   :  { %v138_v45 = vmul.f32 %v228_v39, %v130_v44  ;;  %v147_v48 = vmax.f32 %v145_v46, 0.0 }
 0x22b   :  { %v146_v47 = vadd.f32 %v229_v43, %v138_v45 }
 0x22d   :  { %v148_v49 = vmax.f32 %v146_v47, 0.0 }
 0x22f   :  { %v153_v50 = vpack.c.bf16 %v148_v49, %v147_v48 }
 0x231   :  { %248 = vmatmul.mubr.msk.bf16.vlgmr.msra.gmra.mrb[0].mxu1 %vm103_vm3, %v153_v50 }
 0x304   :  { %v200_v52 = vpop.f32.mrb[0].mxu1 }
 0x305   :  { %v201_v53 = vadd.f32 %v230_v51, %v200_v52  ;;  %v249_v54 = vpop.f32.mrb[1].mxu1 }
 0x306   :  { %v203_v55 = vpop.f32.mrb[2].mxu1 }
 0x307   :  { %207 = vst.msk [vmem:[#allocation5] sm:$0xff] %vm103_vm3, %v201_v53  ;;  %v204_v56 = vadd.f32 %v230_v51, %v203_v55  ;;  %v250_v57 = vpop.f32.mrb[3].mxu1 }
 0x309   :  { %208 = vst.msk [vmem:[#allocation5 + $0x8] sm:$0xff] %vm103_vm3, %v204_v56 }
 0x30a   :  { %294 = shalt.err (!%p291_p12)
}
 0x30b   :  { %s295_s9 = scalar_lea.hbm %s423_s7, 256 }
 0x30c   :  { %p296_p13 = scmp.ne.s32.totalorder %s423_s7, %s295_s9  ;;  %p299_p0 = scmp.lt.u32.totalorder %s295_s9, %s423_s7 }
 0x30e   :  { %p301_p1 = pnand %p299_p0, %p296_p13 }
 0x310   :  { %304 = shalt.err (!%p301_p1)
}
 0x311   :  { %s313_s14 = smov 128   ;;  %s314_s15 = smov 8  }
 0x312   :  { %220 = dma.vmem_to_hbm [thread:$0]  %s215_s30, 256, %s423_s7, [#allocation4], %s313_s14, %s313_s14, %s314_s15  }
 0x313   :  { %307 = dma.done.wait [#allocation4], 256  }
 0x314   :  { %308 = vsyncadd [#allocation4], 4294967040 }
 0x315   :  { %224 = vsyncpa [#allocation3], 1 }
 0x316   :  { %225 = vsyncpa [#allocation4], 1 }

</bundles_post_ra>
